<compile_context>
chip_gen: v7x
topology: tpu7x:2x2x1
jax: 0.10.0
libtpu: 0.0.40
codegen_flags: <defaults>
</compile_context>

<pallas_src>
import functools

import jax
import jax.numpy as jnp
import numpy as np
from jax import lax
from jax.experimental import pallas as pl
from jax.experimental.pallas import tpu as pltpu

KS = (3, 5, 7)          # filter heights (fixed by the module)
KMAX = max(KS)          # 7
PMAX = KMAX - 1         # 6 -> widest padding


def _round_up(v, m):
    return (v + m - 1) // m * m


def _collection_kernel(x_ref, w_ref, b_ref, m_ref, o_ref, acc_ref, *,
                       Hpad, CinDp, Cpad, TB):
    """One batch tile: 7 accumulating shifted-window matmuls + masked max-pool
    + deferred bias/ReLU."""
    # KMAX accumulating matmuls, each reading a shifted row-window directly
    # from the pipelined input ref (no im2col slab), f32 accumulation in VMEM.
    acc_ref[...] = jnp.dot(
        x_ref[:, 0:Hpad, :].reshape(TB * Hpad, CinDp), w_ref[0],
        preferred_element_type=jnp.float32)
    for j in range(1, KMAX):
        acc_ref[...] += jnp.dot(
            x_ref[:, j:j + Hpad, :].reshape(TB * Hpad, CinDp), w_ref[j],
            preferred_element_type=jnp.float32)
    # Additive 0 / -1e30 mask on rows past each filter's valid output range
    # (those rows hold pure zero-padding contributions), then the full-length
    # max pool.  Bias + ReLU commute with the max, so they are applied to the
    # pooled (TB, Cpad) result only.
    y = acc_ref[...].reshape(TB, Hpad, Cpad) + m_ref[...][None]
    o_ref[...] = jnp.maximum(jnp.max(y, axis=1) + b_ref[...], 0.0)


def collection_encoder_forward(x_nchw, params, *, vmem_budget=None):
    """x_nchw: (B, Cin=3, N, D) float32.
    params: [(w, b)] for K in (3, 5, 7); w: (Cout, Cin, K, D), b: (Cout,)."""
    B, Cin, N, D = x_nchw.shape
    Cout = params[0][0].shape[0]
    Cout3 = len(KS) * Cout

    CinD = Cin * D
    CinDp = _round_up(CinD, 128)              # lane-aligned feature dim
    Cpad = _round_up(Cout3, 128)              # lane-aligned output channels
    Hpad = _round_up(N + KMAX - 1, 16)        # fused conv rows; 16-aligned so the
                                              # (TB,Hpad,.) <-> (TB*Hpad,.) reshapes are tile-exact
    Npad = Hpad + 8                           # PMAX front zeros + data + >=PMAX back zeros

    # ---- per-generation batch-tile sizing (v5e/v6e: 128 MiB, v7x: 64 MiB) ----
    try:
        vmem_cap = pltpu.get_tpu_info().vmem_capacity_bytes
    except Exception:
        vmem_cap = 64 * 1024 * 1024
    if vmem_budget is None:
        vmem_budget = max(8 << 20, vmem_cap // 3)
    per_b = (2 * Npad * CinDp * 2             # x block (double-buffered), bf16
             + 2 * Hpad * CinDp * 2           # shifted-window slices feeding the MXU
             + 2 * Hpad * Cpad * 4            # f32 accumulator scratch + masked copy
             + 2 * Cpad * 4)                  # pooled / output rows
    fixed = 2 * (KMAX * CinDp * Cpad * 2      # fused weight (double-buffered), bf16
                 + Cpad * 4                   # bias
                 + Hpad * Cpad * 4)           # additive row mask
    TB = int(min(B, max(1, (vmem_budget - fixed) // per_b), 512))
    if B >= 16:
        # Keep >= 2 grid steps so both v7x TensorCores get work on the
        # "parallel" batch axis (free 2x otherwise lost when grid=(1,)).
        TB = min(TB, _round_up((B + 1) // 2, 8))
    if TB < B:
        TB = TB - TB % 8                      # out-block second-minor must be 8-aligned
        if TB == 0:
            # Unavoidable floor; the small overshoot of the budget heuristic
            # stays well inside the generous vmem_limit_bytes below.
            TB = 8
    Bpad = _round_up(B, TB)
    grid = (Bpad // TB,)

    # ---- host-side glue: cast to bf16 FIRST, then one transpose/pad pass -----
    # TODO(synk): have the upstream FileEncoder emit (B, N, Cin*D) bf16 rows
    # directly so this HBM round trip disappears entirely.
    xflat = jnp.transpose(x_nchw.astype(jnp.bfloat16), (0, 2, 1, 3)).reshape(B, N, CinD)
    xprep = jnp.pad(xflat, ((0, Bpad - B), (PMAX, Npad - PMAX - N), (0, CinDp - CinD)))

    # ---- fused, zero-padded weight / bias / row-validity mask ----------------
    # wf[j, c*D + d, blk*Cout + o] = w_K[o, c, j-(KMAX-K), d] for j >= KMAX-K.
    wf = jnp.zeros((KMAX, CinDp, Cpad), jnp.float32)
    bf = jnp.zeros((1, Cpad), jnp.float32)
    for blk, (w, b) in enumerate(params):
        K = w.shape[2]
        wj = jnp.transpose(w, (2, 1, 3, 0)).reshape(K, CinD, Cout)    # (K, Cin*D, Cout)
        wf = wf.at[KMAX - K:, :CinD, blk * Cout:(blk + 1) * Cout].set(wj)
        bf = bf.at[0, blk * Cout:(blk + 1) * Cout].set(b)
    wf = wf.astype(jnp.bfloat16)

    # Valid output rows for filter K are h < N + K - 1; everything else (and
    # the zero-padded output channels) gets -1e30 so it never wins the max.
    limit = np.zeros((Cpad,), np.int32)
    for blk, K in enumerate(KS):
        limit[blk * Cout:(blk + 1) * Cout] = N + K - 1
    rows = np.arange(Hpad, dtype=np.int32)[:, None]
    maskf = jnp.asarray(np.where(rows < limit[None, :], 0.0, -1e30), jnp.float32)

    kernel = functools.partial(_collection_kernel, Hpad=Hpad, CinDp=CinDp,
                               Cpad=Cpad, TB=TB)

    out = pl.pallas_call(
        kernel,
        out_shape=jax.ShapeDtypeStruct((Bpad, Cpad), jnp.float32),
        grid_spec=pltpu.PrefetchScalarGridSpec(
            num_scalar_prefetch=0,
            grid=grid,
            in_specs=[
                pl.BlockSpec((TB, Npad, CinDp), lambda i: (i, 0, 0)),
                pl.BlockSpec((KMAX, CinDp, Cpad), lambda i: (0, 0, 0)),
                pl.BlockSpec((1, Cpad), lambda i: (0, 0)),
                pl.BlockSpec((Hpad, Cpad), lambda i: (0, 0)),
            ],
            out_specs=pl.BlockSpec((TB, Cpad), lambda i: (i, 0)),
            scratch_shapes=[pltpu.VMEM((TB * Hpad, Cpad), jnp.float32)],
        ),
        compiler_params=pltpu.CompilerParams(
            dimension_semantics=("parallel",),
            vmem_limit_bytes=int(vmem_cap * 3 // 4),
        ),
    )(xprep, wf, bf, maskf)

    return out[:B, :Cout3]


def reference_forward(x_nchw, params):
    """Pure-JAX reference mirroring the PyTorch forward (no batchnorm / dynamic pool)."""
    outs = []
    for (w, b), pad in zip(params, (2, 4, 6)):
        y = lax.conv_general_dilated(
            x_nchw, w, window_strides=(1, 1),
            padding=((pad, pad), (0, 0)),
            dimension_numbers=("NCHW", "OIHW", "NCHW"))
        y = jnp.maximum(y + b[None, :, None, None], 0.0)
        y = jnp.squeeze(y, 3)              # (B, Cout, Hout)
        y = jnp.max(y, axis=2)             # F.max_pool1d(y, y.size(2)).squeeze(2)
        outs.append(y)
    return jnp.concatenate(outs, axis=1)


if __name__ == "__main__":
    # Small deterministic shapes consistent with the module.
    B = 2        # batch
    Cin = 3      # input_channel (fixed to 3 in the module)
    N = 8        # num_sentences (conv "height")
    D = 32       # config.file_channel (conv kernel width spans all of it)
    Cout = 16    # config.output_channel

    key = jax.random.PRNGKey(0)
    key, kx = jax.random.split(key)
    x = jax.random.normal(kx, (B, Cin, N, D), jnp.float32)

    params = []
    for K in KS:
        key, kw, kb = jax.random.split(key, 3)
        w = 0.1 * jax.random.normal(kw, (Cout, Cin, K, D), jnp.float32)
        b = 0.1 * jax.random.normal(kb, (Cout,), jnp.float32)
        params.append((w, b))

    out = jax.block_until_ready(jax.jit(collection_encoder_forward)(x, params))
    assert out.shape == (B, len(KS) * Cout), out.shape

    # Reference with the same bf16 input/weight quantization the kernel uses
    # (accumulation stays f32 in both), so the check isolates the kernel math.
    # TODO(synk): production parity vs. the all-f32 PyTorch module should be
    # validated separately if bf16 activations/weights are not acceptable.
    xq = x.astype(jnp.bfloat16).astype(jnp.float32)
    paramsq = [(w.astype(jnp.bfloat16).astype(jnp.float32), b) for (w, b) in params]
    ref = jax.block_until_ready(reference_forward(xq, paramsq))
    np.testing.assert_allclose(np.asarray(out), np.asarray(ref), rtol=2e-2, atol=2e-2)

    print("KERNEL_OK")
</pallas_src>

<mosaic_0001>
module attributes {stable_mosaic.version = 11 : i64} {
  func.func @_collection_kernel(%arg0: i32, %arg1: memref<2x24x128xbf16, #tpu.memory_space<vmem>>, %arg2: memref<7x128x128xbf16, #tpu.memory_space<vmem>>, %arg3: memref<1x128xf32, #tpu.memory_space<vmem>>, %arg4: memref<16x128xf32, #tpu.memory_space<vmem>>, %arg5: memref<2x128xf32, #tpu.memory_space<vmem>>, %arg6: memref<32x128xf32, #tpu.memory_space<vmem>>) attributes {dimension_semantics = [#tpu.dimension_semantics<parallel>], iteration_bounds = array<i64: 1>, scalar_prefetch = 0 : i64, scratch_operands = 1 : i64, tpu.core_type = #tpu.core_type<tc>, window_params = [{transform_indices = @transform_0, window_bounds = array<i64: 2, 24, 128>}, {pipeline_mode = #tpu.pipeline_mode<synchronous>, transform_indices = @transform_1, window_bounds = array<i64: 7, 128, 128>}, {pipeline_mode = #tpu.pipeline_mode<synchronous>, transform_indices = @transform_2, window_bounds = array<i64: 1, 128>}, {pipeline_mode = #tpu.pipeline_mode<synchronous>, transform_indices = @transform_3, window_bounds = array<i64: 16, 128>}, {transform_indices = @transform_4, window_bounds = array<i64: 2, 128>}]} {
    %c0 = arith.constant 0 : index
    %c0_0 = arith.constant 0 : index
    %c0_1 = arith.constant 0 : index
    %0 = vector.load %arg1[%c0, %c0_0, %c0_1] : memref<2x24x128xbf16, #tpu.memory_space<vmem>>, vector<2x16x128xbf16>
    %1 = vector.shape_cast %0 : vector<2x16x128xbf16> to vector<32x128xbf16>
    %c0_2 = arith.constant 0 : index
    %c0_3 = arith.constant 0 : index
    %c0_4 = arith.constant 0 : index
    %2 = vector.load %arg2[%c0_2, %c0_3, %c0_4] : memref<7x128x128xbf16, #tpu.memory_space<vmem>>, vector<1x128x128xbf16>
    %3 = vector.shape_cast %2 : vector<1x128x128xbf16> to vector<128x128xbf16>
    %cst = arith.constant dense<0.000000e+00> : vector<32x128xf32>
    %4 = tpu.matmul %1, %3, %cst {dimension_numbers = #tpu.dot_dimension_numbers<[1], [0], [0], [1], [0, 0, 1, 1], [], []>} : vector<32x128xbf16>, vector<128x128xbf16>, vector<32x128xf32> -> vector<32x128xf32>
    %c0_5 = arith.constant 0 : index
    %c0_6 = arith.constant 0 : index
    %5 = vector.load %arg6[%c0_5, %c0_6] : memref<32x128xf32, #tpu.memory_space<vmem>>, vector<32x128xf32>
    tpu.vector_store %arg6[%c0_5, %c0_6], %4 {strides = array<i32>} : memref<32x128xf32, #tpu.memory_space<vmem>>, vector<32x128xf32>,
    %c0_7 = arith.constant 0 : index
    %c0_8 = arith.constant 0 : index
    %6 = vector.load %arg6[%c0_7, %c0_8] : memref<32x128xf32, #tpu.memory_space<vmem>>, vector<32x128xf32>
    %c0_9 = arith.constant 0 : index
    %c1 = arith.constant 1 : index
    %c0_10 = arith.constant 0 : index
    %7 = vector.load %arg1[%c0_9, %c1, %c0_10] : memref<2x24x128xbf16, #tpu.memory_space<vmem>>, vector<2x16x128xbf16>
    %8 = vector.shape_cast %7 : vector<2x16x128xbf16> to vector<32x128xbf16>
    %c1_11 = arith.constant 1 : index
    %c0_12 = arith.constant 0 : index
    %c0_13 = arith.constant 0 : index
    %9 = vector.load %arg2[%c1_11, %c0_12, %c0_13] : memref<7x128x128xbf16, #tpu.memory_space<vmem>>, vector<1x128x128xbf16>
    %10 = vector.shape_cast %9 : vector<1x128x128xbf16> to vector<128x128xbf16>
    %cst_14 = arith.constant dense<0.000000e+00> : vector<32x128xf32>
    %11 = tpu.matmul %8, %10, %cst_14 {dimension_numbers = #tpu.dot_dimension_numbers<[1], [0], [0], [1], [0, 0, 1, 1], [], []>} : vector<32x128xbf16>, vector<128x128xbf16>, vector<32x128xf32> -> vector<32x128xf32>
    %12 = arith.addf %6, %11 : vector<32x128xf32>
    %c0_15 = arith.constant 0 : index
    %c0_16 = arith.constant 0 : index
    %13 = vector.load %arg6[%c0_15, %c0_16] : memref<32x128xf32, #tpu.memory_space<vmem>>, vector<32x128xf32>
    tpu.vector_store %arg6[%c0_15, %c0_16], %12 {strides = array<i32>} : memref<32x128xf32, #tpu.memory_space<vmem>>, vector<32x128xf32>,
    %c0_17 = arith.constant 0 : index
    %c0_18 = arith.constant 0 : index
    %14 = vector.load %arg6[%c0_17, %c0_18] : memref<32x128xf32, #tpu.memory_space<vmem>>, vector<32x128xf32>
    %c0_19 = arith.constant 0 : index
    %c2 = arith.constant 2 : index
    %c0_20 = arith.constant 0 : index
    %15 = vector.load %arg1[%c0_19, %c2, %c0_20] : memref<2x24x128xbf16, #tpu.memory_space<vmem>>, vector<2x16x128xbf16>
    %16 = vector.shape_cast %15 : vector<2x16x128xbf16> to vector<32x128xbf16>
    %c2_21 = arith.constant 2 : index
    %c0_22 = arith.constant 0 : index
    %c0_23 = arith.constant 0 : index
    %17 = vector.load %arg2[%c2_21, %c0_22, %c0_23] : memref<7x128x128xbf16, #tpu.memory_space<vmem>>, vector<1x128x128xbf16>
    %18 = vector.shape_cast %17 : vector<1x128x128xbf16> to vector<128x128xbf16>
    %cst_24 = arith.constant dense<0.000000e+00> : vector<32x128xf32>
    %19 = tpu.matmul %16, %18, %cst_24 {dimension_numbers = #tpu.dot_dimension_numbers<[1], [0], [0], [1], [0, 0, 1, 1], [], []>} : vector<32x128xbf16>, vector<128x128xbf16>, vector<32x128xf32> -> vector<32x128xf32>
    %20 = arith.addf %14, %19 : vector<32x128xf32>
    %c0_25 = arith.constant 0 : index
    %c0_26 = arith.constant 0 : index
    %21 = vector.load %arg6[%c0_25, %c0_26] : memref<32x128xf32, #tpu.memory_space<vmem>>, vector<32x128xf32>
    tpu.vector_store %arg6[%c0_25, %c0_26], %20 {strides = array<i32>} : memref<32x128xf32, #tpu.memory_space<vmem>>, vector<32x128xf32>,
    %c0_27 = arith.constant 0 : index
    %c0_28 = arith.constant 0 : index
    %22 = vector.load %arg6[%c0_27, %c0_28] : memref<32x128xf32, #tpu.memory_space<vmem>>, vector<32x128xf32>
    %c0_29 = arith.constant 0 : index
    %c3 = arith.constant 3 : index
    %c0_30 = arith.constant 0 : index
    %23 = vector.load %arg1[%c0_29, %c3, %c0_30] : memref<2x24x128xbf16, #tpu.memory_space<vmem>>, vector<2x16x128xbf16>
    %24 = vector.shape_cast %23 : vector<2x16x128xbf16> to vector<32x128xbf16>
    %c3_31 = arith.constant 3 : index
    %c0_32 = arith.constant 0 : index
    %c0_33 = arith.constant 0 : index
    %25 = vector.load %arg2[%c3_31, %c0_32, %c0_33] : memref<7x128x128xbf16, #tpu.memory_space<vmem>>, vector<1x128x128xbf16>
    %26 = vector.shape_cast %25 : vector<1x128x128xbf16> to vector<128x128xbf16>
    %cst_34 = arith.constant dense<0.000000e+00> : vector<32x128xf32>
    %27 = tpu.matmul %24, %26, %cst_34 {dimension_numbers = #tpu.dot_dimension_numbers<[1], [0], [0], [1], [0, 0, 1, 1], [], []>} : vector<32x128xbf16>, vector<128x128xbf16>, vector<32x128xf32> -> vector<32x128xf32>
    %28 = arith.addf %22, %27 : vector<32x128xf32>
    %c0_35 = arith.constant 0 : index
    %c0_36 = arith.constant 0 : index
    %29 = vector.load %arg6[%c0_35, %c0_36] : memref<32x128xf32, #tpu.memory_space<vmem>>, vector<32x128xf32>
    tpu.vector_store %arg6[%c0_35, %c0_36], %28 {strides = array<i32>} : memref<32x128xf32, #tpu.memory_space<vmem>>, vector<32x128xf32>,
    %c0_37 = arith.constant 0 : index
    %c0_38 = arith.constant 0 : index
    %30 = vector.load %arg6[%c0_37, %c0_38] : memref<32x128xf32, #tpu.memory_space<vmem>>, vector<32x128xf32>
    %c0_39 = arith.constant 0 : index
    %c4 = arith.constant 4 : index
    %c0_40 = arith.constant 0 : index
    %31 = vector.load %arg1[%c0_39, %c4, %c0_40] : memref<2x24x128xbf16, #tpu.memory_space<vmem>>, vector<2x16x128xbf16>
    %32 = vector.shape_cast %31 : vector<2x16x128xbf16> to vector<32x128xbf16>
    %c4_41 = arith.constant 4 : index
    %c0_42 = arith.constant 0 : index
    %c0_43 = arith.constant 0 : index
    %33 = vector.load %arg2[%c4_41, %c0_42, %c0_43] : memref<7x128x128xbf16, #tpu.memory_space<vmem>>, vector<1x128x128xbf16>
    %34 = vector.shape_cast %33 : vector<1x128x128xbf16> to vector<128x128xbf16>
    %cst_44 = arith.constant dense<0.000000e+00> : vector<32x128xf32>
    %35 = tpu.matmul %32, %34, %cst_44 {dimension_numbers = #tpu.dot_dimension_numbers<[1], [0], [0], [1], [0, 0, 1, 1], [], []>} : vector<32x128xbf16>, vector<128x128xbf16>, vector<32x128xf32> -> vector<32x128xf32>
    %36 = arith.addf %30, %35 : vector<32x128xf32>
    %c0_45 = arith.constant 0 : index
    %c0_46 = arith.constant 0 : index
    %37 = vector.load %arg6[%c0_45, %c0_46] : memref<32x128xf32, #tpu.memory_space<vmem>>, vector<32x128xf32>
    tpu.vector_store %arg6[%c0_45, %c0_46], %36 {strides = array<i32>} : memref<32x128xf32, #tpu.memory_space<vmem>>, vector<32x128xf32>,
    %c0_47 = arith.constant 0 : index
    %c0_48 = arith.constant 0 : index
    %38 = vector.load %arg6[%c0_47, %c0_48] : memref<32x128xf32, #tpu.memory_space<vmem>>, vector<32x128xf32>
    %c0_49 = arith.constant 0 : index
    %c5 = arith.constant 5 : index
    %c0_50 = arith.constant 0 : index
    %39 = vector.load %arg1[%c0_49, %c5, %c0_50] : memref<2x24x128xbf16, #tpu.memory_space<vmem>>, vector<2x16x128xbf16>
    %40 = vector.shape_cast %39 : vector<2x16x128xbf16> to vector<32x128xbf16>
    %c5_51 = arith.constant 5 : index
    %c0_52 = arith.constant 0 : index
    %c0_53 = arith.constant 0 : index
    %41 = vector.load %arg2[%c5_51, %c0_52, %c0_53] : memref<7x128x128xbf16, #tpu.memory_space<vmem>>, vector<1x128x128xbf16>
    %42 = vector.shape_cast %41 : vector<1x128x128xbf16> to vector<128x128xbf16>
    %cst_54 = arith.constant dense<0.000000e+00> : vector<32x128xf32>
    %43 = tpu.matmul %40, %42, %cst_54 {dimension_numbers = #tpu.dot_dimension_numbers<[1], [0], [0], [1], [0, 0, 1, 1], [], []>} : vector<32x128xbf16>, vector<128x128xbf16>, vector<32x128xf32> -> vector<32x128xf32>
    %44 = arith.addf %38, %43 : vector<32x128xf32>
    %c0_55 = arith.constant 0 : index
    %c0_56 = arith.constant 0 : index
    %45 = vector.load %arg6[%c0_55, %c0_56] : memref<32x128xf32, #tpu.memory_space<vmem>>, vector<32x128xf32>
    tpu.vector_store %arg6[%c0_55, %c0_56], %44 {strides = array<i32>} : memref<32x128xf32, #tpu.memory_space<vmem>>, vector<32x128xf32>,
    %c0_57 = arith.constant 0 : index
    %c0_58 = arith.constant 0 : index
    %46 = vector.load %arg6[%c0_57, %c0_58] : memref<32x128xf32, #tpu.memory_space<vmem>>, vector<32x128xf32>
    %c0_59 = arith.constant 0 : index
    %c6 = arith.constant 6 : index
    %c0_60 = arith.constant 0 : index
    %47 = vector.load %arg1[%c0_59, %c6, %c0_60] : memref<2x24x128xbf16, #tpu.memory_space<vmem>>, vector<2x16x128xbf16>
    %48 = vector.shape_cast %47 : vector<2x16x128xbf16> to vector<32x128xbf16>
    %c6_61 = arith.constant 6 : index
    %c0_62 = arith.constant 0 : index
    %c0_63 = arith.constant 0 : index
    %49 = vector.load %arg2[%c6_61, %c0_62, %c0_63] : memref<7x128x128xbf16, #tpu.memory_space<vmem>>, vector<1x128x128xbf16>
    %50 = vector.shape_cast %49 : vector<1x128x128xbf16> to vector<128x128xbf16>
    %cst_64 = arith.constant dense<0.000000e+00> : vector<32x128xf32>
    %51 = tpu.matmul %48, %50, %cst_64 {dimension_numbers = #tpu.dot_dimension_numbers<[1], [0], [0], [1], [0, 0, 1, 1], [], []>} : vector<32x128xbf16>, vector<128x128xbf16>, vector<32x128xf32> -> vector<32x128xf32>
    %52 = arith.addf %46, %51 : vector<32x128xf32>
    %c0_65 = arith.constant 0 : index
    %c0_66 = arith.constant 0 : index
    %53 = vector.load %arg6[%c0_65, %c0_66] : memref<32x128xf32, #tpu.memory_space<vmem>>, vector<32x128xf32>
    tpu.vector_store %arg6[%c0_65, %c0_66], %52 {strides = array<i32>} : memref<32x128xf32, #tpu.memory_space<vmem>>, vector<32x128xf32>,
    %c0_67 = arith.constant 0 : index
    %c0_68 = arith.constant 0 : index
    %54 = vector.load %arg6[%c0_67, %c0_68] : memref<32x128xf32, #tpu.memory_space<vmem>>, vector<32x128xf32>
    %55 = vector.shape_cast %54 : vector<32x128xf32> to vector<2x16x128xf32>
    %c0_69 = arith.constant 0 : index
    %c0_70 = arith.constant 0 : index
    %56 = vector.load %arg4[%c0_69, %c0_70] : memref<16x128xf32, #tpu.memory_space<vmem>>, vector<16x128xf32>
    %57 = vector.shape_cast %56 : vector<16x128xf32> to vector<1x16x128xf32>
    %58 = vector.broadcast %57 : vector<1x16x128xf32> to vector<2x16x128xf32>
    %59 = arith.addf %55, %58 : vector<2x16x128xf32>
    %cst_71 = arith.constant dense<0xFF800000> : vector<2x128xf32>
    %60 = vector.multi_reduction <maximumf>, %59, %cst_71 [1] : vector<2x16x128xf32> to vector<2x128xf32>
    %c0_72 = arith.constant 0 : index
    %c0_73 = arith.constant 0 : index
    %61 = vector.load %arg3[%c0_72, %c0_73] : memref<1x128xf32, #tpu.memory_space<vmem>>, vector<1x128xf32>
    %62 = vector.broadcast %61 : vector<1x128xf32> to vector<2x128xf32>
    %63 = arith.addf %60, %62 : vector<2x128xf32>
    %cst_74 = arith.constant 0.000000e+00 : f32
    %64 = vector.broadcast %cst_74 : f32 to vector<2x128xf32>
    %65 = arith.maximumf %63, %64 : vector<2x128xf32>
    %c0_75 = arith.constant 0 : index
    %c0_76 = arith.constant 0 : index
    %66 = vector.load %arg5[%c0_75, %c0_76] : memref<2x128xf32, #tpu.memory_space<vmem>>, vector<2x128xf32>
    tpu.vector_store %arg5[%c0_75, %c0_76], %65 {strides = array<i32>} : memref<2x128xf32, #tpu.memory_space<vmem>>, vector<2x128xf32>,
    return
  }
  func.func @transform_0(%arg0: i32) -> (i32, i32, i32) {
    %c0_i32 = arith.constant 0 : i32
    %c0_i32_0 = arith.constant 0 : i32
    %c0_i32_1 = arith.constant 0 : i32
    return %arg0, %c0_i32, %c0_i32_0 : i32, i32, i32
  }
  func.func @transform_1(%arg0: i32) -> (i32, i32, i32) {
    %c0_i32 = arith.constant 0 : i32
    %c0_i32_0 = arith.constant 0 : i32
    %c0_i32_1 = arith.constant 0 : i32
    %c0_i32_2 = arith.constant 0 : i32
    return %c0_i32, %c0_i32_0, %c0_i32_1 : i32, i32, i32
  }
  func.func @transform_2(%arg0: i32) -> (i32, i32) {
    %c0_i32 = arith.constant 0 : i32
    %c0_i32_0 = arith.constant 0 : i32
    %c0_i32_1 = arith.constant 0 : i32
    return %c0_i32, %c0_i32_0 : i32, i32
  }
  func.func @transform_3(%arg0: i32) -> (i32, i32) {
    %c0_i32 = arith.constant 0 : i32
    %c0_i32_0 = arith.constant 0 : i32
    %c0_i32_1 = arith.constant 0 : i32
    return %c0_i32, %c0_i32_0 : i32, i32
  }
  func.func @transform_4(%arg0: i32) -> (i32, i32) {
    %c0_i32 = arith.constant 0 : i32
    %c0_i32_0 = arith.constant 0 : i32
    return %arg0, %c0_i32 : i32, i32
  }
}

</mosaic_0001>

<bundles_post_ra>
// kernel: collection_encoder_forward.1
= control target key start
LH: loop header
LB: loop body
LE: loop exit
PB: predicated region body
PF: predicated region fallthrough
CT: control target
= control target key end

     0   :  { %vm516_vm0 = vsmask.f32 2304  ;;  %vm517_vm1 = vsmask.f32 6416  ;;  %vm721_vm3 = vcmask 1041408   ;;  %vm722_vm4 = vcmask 1045508   ;;  %s2185_s0 = inlined_call_operand.vmem [shape: bf16[2,24,128], index: 0, kind: input, shape index: {}]   ;;  %s2186_s1 = inlined_call_operand.vmem [shape: bf16[7,128,128], index: 1, kind: input, shape index: {}]   ;;  %s2187_s2 = inlined_call_operand.vmem [shape: f32[1,128], index: 2, kind: input, shape index: {}]   ;;  %s2188_s3 = inlined_call_operand.vmem [shape: f32[16,128], index: 3, kind: input, shape index: {}]   ;;  %s2189_s4 = inlined_call_operand.hbm [shape: f32[2,128], index: 4, kind: output, shape index: {}]  }
   0x1   :  { %v1694_v0 = vld [vmem:[%s2186_s1] sm:$0xff]   ;;  %v1696_v2 = vld [vmem:[%s2186_s1 + $0x8] sm:$0xff]   ;;  %v1698_v4 = vld [vmem:[%s2186_s1 + $0x10] sm:$0xff]   ;;  %vm162_vm5 = vsmask.f32 3328  ;;  %vm359_vm9 = vcmask 1042432  }
   0x2   :  { %v1695_v1 = vld [vmem:[%s2186_s1 + $0xc0] sm:$0xff]   ;;  %1529 = vmatprep.subr.bf16.mxu1 %v1694_v0  ;;  %v1697_v3 = vld [vmem:[%s2186_s1 + $0xc8] sm:$0xff]   ;;  %v1699_v5 = vld [vmem:[%s2186_s1 + $0xd0] sm:$0xff]   ;;  %vm163_vm6 = vsmask.f32 7440  ;;  %vm360_vm10 = vcmask 1046532  }
   0x3   :  { %1589 = vmatprep.subr.bf16.mxu0 %v1695_v1  ;;  %1530 = vmatpush3.bf16.msra.mxu1 %v1694_v0  ;;  %v1700_v6 = vld [vmem:[%s2186_s1 + $0x18] sm:$0xff]   ;;  %v1702_v8 = vld [vmem:[%s2186_s1 + $0x20] sm:$0xff]   ;;  %v1704_v10 = vld [vmem:[%s2186_s1 + $0x28] sm:$0xff]   ;;  %vm878_vm12 = vsmask.f32 1280 }
   0x4   :  { %1590 = vmatpush3.bf16.msra.mxu0 %v1695_v1  ;;  %1531 = vmatprep.subr.bf16.mxu1 %v1696_v2  ;;  %v1701_v7 = vld [vmem:[%s2186_s1 + $0xd8] sm:$0xff]   ;;  %v1703_v9 = vld [vmem:[%s2186_s1 + $0xe0] sm:$0xff]   ;;  %v1705_v12 = vld [vmem:[%s2186_s1 + $0xe8] sm:$0xff]   ;;  %vm879_vm13 = vsmask.f32 5392 }
   0x5   :  { %1591 = vmatprep.subr.bf16.mxu0 %v1697_v3  ;;  %v1710_v11 = vld [vmem:[%s2185_s0] sm:$0xff]   ;;  %v512_v15 = vld [vmem:[%s2185_s0 + $0x8] sm:$0x3]  ;;  %v1706_v16 = vld [vmem:[%s2186_s1 + $0x30] sm:$0xff]  }
   0x6   :  { %1545 = vmatprep.mubr.bf16.mxu1 %v1710_v11  ;;  %v510_v13 = vld [vmem:[%s2185_s0] sm:$0xe]  ;;  %v511_v14 = vld [vmem:[%s2185_s0 + $0x4] sm:$0xf]  ;;  %v1707_v17 = vld [vmem:[%s2186_s1 + $0xf0] sm:$0xff]   ;;  %v539_v22 = vshrl.u32 %v512_v15, 16 }
   0x7   :  { %1532 = vmatpush3.bf16.msra.mxu1 %v1696_v2  ;;  %v520_v18 = vshrl.u32 %v510_v13, 16  ;;  %v523_v19 = vshll.u32 %v510_v13, 16  ;;  %v529_v20 = vshrl.u32 %v511_v14, 16  ;;  %v532_v21 = vshll.u32 %v511_v14, 16  ;;  %v1708_v26 = vld [vmem:[%s2186_s1 + $0x38] sm:$0xff]   ;;  %vm1870_vm2 = vmor %vm516_vm0, %vm517_vm1  ;;  %v1711_v49 = vld [vmem:[%s2186_s1 + $0x40] sm:$0xff]  }
   0x8   :  { %1592 = vmatpush3.bf16.msra.mxu0 %v1697_v3  ;;  %1533 = vmatprep.subr.bf16.mxu1 %v1698_v4  ;;  %v542_v23 = vshll.u32 %v512_v15, 16  ;;  %v541_v29 = vrot.slane %v539_v22, 5  ;;  %v1709_v31 = vld [vmem:[%s2186_s1 + $0xf8] sm:$0xff]   ;;  %v513_v33 = vld [vmem:[%s2185_s0 + $0xc] sm:$0xe]  ;;  %v1712_v55 = vld [vmem:[%s2186_s1 + $0x100] sm:$0xff]  }
   0x9   :  { %1593 = vmatprep.subr.bf16.mxu0 %v1699_v5  ;;  %v522_v24 = vrot.slane %v520_v18, 5  ;;  %v525_v25 = vrot.slane %v523_v19, 6  ;;  %v531_v27 = vrot.slane %v529_v20, 5  ;;  %v534_v28 = vrot.slane %v532_v21, 6  ;;  %v514_v34 = vld [vmem:[%s2185_s0 + $0x10] sm:$0xf]  ;;  %vm1932_vm7 = vmor %vm721_vm3, %vm722_vm4 }
   0xa   :  { %v544_v30 = vrot.slane %v542_v23, 6  ;;  %v515_v38 = vld [vmem:[%s2185_s0 + $0x14] sm:$0x3]  ;;  %v548_v39 = vshrl.u32 %v513_v33, 16  ;;  %v551_v40 = vshll.u32 %v513_v33, 16  ;;  %v557_v42 = vshrl.u32 %v514_v34, 16  ;;  %vm1944_vm8 = vmor %vm162_vm5, %vm163_vm6 }
   0xb   :  { %1534 = vmatpush3.bf16.msra.mxu1 %v1698_v4  ;;  %v526_v32 = vor.u32 %v525_v25, %v522_v24  ;;  %v535_v36 = vor.u32 %v534_v28, %v531_v27  ;;  %v560_v43 = vshll.u32 %v514_v34, 16  ;;  %v567_v44 = vshrl.u32 %v515_v38, 16  ;;  %v1713_v60 = vld [vmem:[%s2185_s0 + $0xc] sm:$0xff]   ;;  %v1719_v13 = vld [vmem:[%s2186_s1 + $0x118] sm:$0xff]   ;;  %v709_v19 = vld [vmem:[%s2185_s0] sm:$0xc] }
   0xc   :  { %1594 = vmatpush3.bf16.msra.mxu0 %v1699_v5  ;;  %1535 = vmatprep.subr.bf16.mxu1 %v1700_v6  ;;  %v545_v37 = vor.u32 %v544_v30, %v541_v29  ;;  %v550_v46 = vrot.slane %v548_v39, 5  ;;  %v553_v47 = vrot.slane %v551_v40, 6  ;;  %v570_v48 = vshll.u32 %v515_v38, 16  ;;  %v1714_v1 = vld [vmem:[%s2186_s1 + $0x48] sm:$0xff]   ;;  %v1716_v5 = vld [vmem:[%s2186_s1 + $0x50] sm:$0xff]   ;;  %v1720_v20 = vld [vmem:[%s2186_s1 + $0x60] sm:$0xff]  }
   0xd   :  { %1595 = vmatprep.subr.bf16.mxu0 %v1701_v7  ;;  %v527_v41 = vrot.slane %v526_v32, 4  ;;  %v537_v45 = vrot.slane %v535_v36, 4  ;;  %v559_v51 = vrot.slane %v557_v42, 5  ;;  %v562_v52 = vrot.slane %v560_v43, 6  ;;  %v1715_v4 = vld [vmem:[%s2186_s1 + $0x108] sm:$0xff]   ;;  %vm2018_vm11 = vmor %vm359_vm9, %vm360_vm10 }
   0xe   :  { %v569_v53 = vrot.slane %v567_v44, 5  ;;  %v554_v56 = vor.u32 %v553_v47, %v550_v46  ;;  %v572_v57 = vrot.slane %v570_v48, 6  ;;  %v710_v23 = vld [vmem:[%s2185_s0 + $0x4] sm:$0xf]  ;;  %v1376_v25 = vrot.slane %v709_v19, 10  ;;  %v1722_v40 = vld [vmem:[%s2186_s1 + $0x68] sm:$0xff]   ;;  %vm2061_vm14 = vmor %vm878_vm12, %vm879_vm13 }
   0xf   :  { %1536 = vmatpush3.bf16.msra.mxu1 %v1700_v6  ;;  %v536_v50 = vsel %vm1870_vm2, %v527_v41, %v535_v36  ;;  %v546_v54 = vsel %vm1870_vm2, %v537_v45, %v545_v37  ;;  %v563_v59 = vor.u32 %v562_v52, %v559_v51  ;;  %v1717_v6 = vld [vmem:[%s2186_s1 + $0x110] sm:$0xff]   ;;  %v711_v28 = vld [vmem:[%s2185_s0 + $0x8] sm:$0x3]  ;;  %v726_v29 = vrot.slane %v710_v23, 6  ;;  %v159_v34 = vld [vmem:[%s2185_s0 + $0xc] sm:$0xf] }
  0x10   :  { %1596 = vmatpush3.bf16.msra.mxu0 %v1701_v7  ;;  %1537 = vmatprep.subr.bf16.mxu1 %v1702_v8  ;;  %v1366_v58 = vcombine.low %v536_v50, %v546_v54  ;;  %v555_v61 = vrot.slane %v554_v56, 4  ;;  %v573_v62 = vor.u32 %v572_v57, %v569_v53  ;;  %v1718_v7 = vld [vmem:[%s2186_s1 + $0x58] sm:$0xff]   ;;  %v729_v33 = vrot.slane %v711_v28, 6  ;;  %v160_v38 = vld [vmem:[%s2185_s0 + $0x10] sm:$0xf]  ;;  %v1723_v45 = vld [vmem:[%s2186_s1 + $0x128] sm:$0xff]  }
  0x11   :  { %1597 = vmatprep.subr.bf16.mxu0 %v1703_v9  ;;  %v565_v63 = vrot.slane %v563_v59, 4  ;;  %v727_v36 = vsel %vm1932_vm7, %v1376_v25, %v726_v29  ;;  %v728_v37 = vrot.slane %v726_v29, 4  ;;  %v161_v39 = vld [vmem:[%s2185_s0 + $0x14] sm:$0x1]  ;;  %v190_v42 = vshrl.u32 %v159_v34, 16  ;;  %v1731_v23 = vld [vmem:[%s2186_s1 + $0x148] sm:$0xff]  }
  0x12   :  { %1605 = vmatprep.mubr.bf16.mxu0 %v1366_v58  ;;  %v564_v0 = vsel %vm1870_vm2, %v555_v61, %v563_v59  ;;  %v193_v43 = vshll.u32 %v159_v34, 16  ;;  %v199_v44 = vshll.u32 %v160_v38, 16  ;;  %v203_v48 = vshrl.u32 %v160_v38, 16  ;;  %v713_v50 = vld [vmem:[%s2185_s0 + $0x10] sm:$0xf] }
  0x13   :  { %1538 = vmatpush3.bf16.msra.mxu1 %v1702_v8  ;;  %v574_v2 = vsel %vm1870_vm2, %v565_v63, %v573_v62  ;;  %v156_v8 = vld [vmem:[%s2185_s0] sm:$0xf]  ;;  %v730_v47 = vsel %vm1932_vm7, %v728_v37, %v729_v33  ;;  %v192_v53 = vrot.slane %v190_v42, 4  ;;  %v712_v58 = vld [vmem:[%s2185_s0 + $0xc] sm:$0xc]  ;;  %v1724_v59 = vld [vmem:[%s2186_s1 + $0x70] sm:$0xff]  }
  0x14   :  { %1598 = vmatpush3.bf16.msra.mxu0 %v1703_v9  ;;  %1539 = vmatprep.subr.bf16.mxu1 %v1704_v10  ;;  %v1367_v3 = vcombine.low %v564_v0, %v574_v2  ;;  %v157_v9 = vld [vmem:[%s2185_s0 + $0x4] sm:$0xf]  ;;  %v166_v11 = vshrl.u32 %v156_v8, 16  ;;  %v1394_v52 = vcombine.low %v727_v36, %v730_v47  ;;  %v195_v54 = vrot.slane %v193_v43, 5  ;;  %v1726_v0 = vld [vmem:[%s2186_s1 + $0x78] sm:$0xff]  }
  0x15   :  { %1599 = vmatprep.subr.bf16.mxu0 %v1705_v12  ;;  %v175_v14 = vshll.u32 %v157_v9, 16  ;;  %v179_v15 = vshrl.u32 %v157_v9, 16  ;;  %v201_v56 = vrot.slane %v199_v44, 5  ;;  %v205_v57 = vrot.slane %v203_v48, 4  ;;  %v714_v2 = vld [vmem:[%s2185_s0 + $0x14] sm:$0x3] }
  0x16   :  { %v196_v61 = vor.u32 %v195_v54, %v192_v53  ;;  %v733_v62 = vrot.slane %v713_v50, 6  ;;  %v348_v19 = vld [vmem:[%s2185_s0 + $0x4] sm:$0xf]  ;;  %v1735_v50 = vld [vmem:[%s2186_s1 + $0x158] sm:$0xff]  }
  0x17   :  { %1540 = vmatpush3.bf16.msra.mxu1 %v1704_v10  ;;  %v158_v10 = vld [vmem:[%s2185_s0 + $0x8] sm:$0x1]  ;;  %v177_v21 = vrot.slane %v175_v14, 5  ;;  %v181_v22 = vrot.slane %v179_v15, 4  ;;  %v206_v63 = vor.u32 %v205_v57, %v201_v56  ;;  %v1729_v14 = vld [vmem:[%s2186_s1 + $0x140] sm:$0xff]   ;;  %v364_v24 = vrot.slane %v348_v19, 5 }
  0x18   :  { %1600 = vmatpush3.bf16.msra.mxu0 %v1705_v12  ;;  %1541 = vmatprep.subr.bf16.mxu1 %v1706_v16  ;;  %v169_v12 = vshll.u32 %v156_v8, 16  ;;  %v1727_v8 = vld [vmem:[%s2186_s1 + $0x138] sm:$0xff]   ;;  %v873_v30 = vld [vmem:[%s2185_s0 + $0x4] sm:$0xf] }
  0x19   :  { %1601 = vmatprep.subr.bf16.mxu0 %v1707_v17  ;;  %v366_v29 = vrot.slane %v364_v24, 4  ;;  %v891_v36 = vshrl.u32 %v873_v30, 16  ;;  %v894_v38 = vshll.u32 %v873_v30, 16 }
  0x1a   :  { %v171_v18 = vrot.slane %v169_v12, 5 }
  0x1b   :  { %1542 = vmatpush3.bf16.msra.mxu1 %v1706_v16  ;;  %v185_v16 = vshll.u32 %v158_v10, 16  ;;  %v893_v44 = vrot.slane %v891_v36, 6 }
  0x1c   :  { %1602 = vmatpush3.bf16.msra.mxu0 %v1707_v17  ;;  %1543 = vmatprep.subr.bf16.mxu1 %v1708_v26  ;;  %v168_v17 = vrot.slane %v166_v11, 4  ;;  %v1728_v11 = vld [vmem:[%s2186_s1 + $0x80] sm:$0xff]  }
  0x1d   :  { %1603 = vmatprep.subr.bf16.mxu0 %v1709_v31  ;;  %v187_v32 = vrot.slane %v185_v16, 5 }
  0x1e   :  { %v172_v27 = vor.u32 %v171_v18, %v168_v17  ;;  %v1730_v17 = vld [vmem:[%s2186_s1 + $0x88] sm:$0xff]   ;;  %v347_v18 = vld [vmem:[%s2185_s0] sm:$0xe] }
  0x1f   :  { %1544 = vmatpush3.bf16.msra.mxu1 %v1708_v26  ;;  %v1721_v26 = vld [vmem:[%s2186_s1 + $0x120] sm:$0xff]  }
  0x20   :  { %1604 = vmatpush3.bf16.msra.mxu0 %v1709_v31  ;;  %1549 = vmatprep.subr.bf16.mxu1 %v1711_v49  ;;  %v182_v31 = vor.u32 %v181_v22, %v177_v21  ;;  %v173_v35 = vrot.slane %v172_v27, 4  ;;  %v1322_v22 = vrot.slane %v347_v18, 9  ;;  %v1732_v27 = vld [vmem:[%s2186_s1 + $0x90] sm:$0xff]  }
  0x21   :  { %1609 = vmatprep.subr.bf16.mxu0 %v1712_v55 }
  0x22   :  { %1546 = vmatmul.mubr.bf16.vlgmr.msra.gmra.mrb[0].mxu1 %v1713_v60  ;;  %v183_v41 = vrot.slane %v182_v31, 4  ;;  %v178_v46 = vsel %vm1944_vm8, %v173_v35, %v177_v21  ;;  %v1725_v60 = vld [vmem:[%s2186_s1 + $0x130] sm:$0xff]   ;;  %v365_v28 = vsel %vm2018_vm11, %v1322_v22, %v364_v24  ;;  %v874_v31 = vld [vmem:[%s2185_s0 + $0x8] sm:$0x7] }
  0x23   :  { %1550 = vmatpush3.bf16.msra.mxu1 %v1711_v49  ;;  %1606 = vmatmul.mubr.bf16.vlgmr.msra.gmra.mrb[0].mxu0 %v1367_v3  ;;  %v209_v49 = vshll.u32 %v161_v39, 16  ;;  %v1377_v3 = vrot.slane %v712_v58, 10  ;;  %v901_v39 = vshrl.u32 %v874_v31, 16  ;;  %v904_v48 = vshll.u32 %v874_v31, 16  ;;  %v1736_v58 = vld [vmem:[%s2186_s1 + $0xa0] sm:$0xff]  }
  0x24   :  { %1551 = vmatprep.subr.bf16.mxu1 %v1714_v1  ;;  %1610 = vmatpush3.bf16.msra.mxu0 %v1712_v55  ;;  %v188_v51 = vsel %vm1944_vm8, %v183_v41, %v187_v32  ;;  %v1733_v32 = vld [vmem:[%s2186_s1 + $0x150] sm:$0xff]   ;;  %v1734_v41 = vld [vmem:[%s2186_s1 + $0x98] sm:$0xff]  }
  0x25   :  { %1611 = vmatprep.subr.bf16.mxu0 %v1715_v4  ;;  %v1312_v55 = vcombine.low %v178_v46, %v188_v51  ;;  %1625 = vmatprep.mubr.bf16.mxu0 %v1394_v52  ;;  %v734_v12 = vsel %vm1932_vm7, %v1377_v3, %v733_v62  ;;  %v896_v46 = vrot.slane %v894_v38, 7  ;;  %v903_v47 = vrot.slane %v901_v39, 6  ;;  %v877_v52 = vld [vmem:[%s2185_s0 + $0x14] sm:$0x7]  ;;  %v351_v3 = vld [vmem:[%s2185_s0 + $0x10] sm:$0xf] }
  0x27   :  { %1552 = vmatpush3.bf16.msra.mxu1 %v1714_v1  ;;  %1565 = vmatprep.mubr.bf16.mxu1 %v1312_v55  ;;  %v211_v1 = vrot.slane %v209_v49, 5  ;;  %v897_v54 = vor.u32 %v896_v46, %v893_v44  ;;  %v906_v55 = vrot.slane %v904_v48, 7 }
  0x28   :  { %1553 = vmatprep.subr.bf16.mxu1 %v1716_v5  ;;  %1612 = vmatpush3.bf16.msra.mxu0 %v1715_v4  ;;  %v197_v4 = vrot.slane %v196_v61, 4  ;;  %v1737_v61 = vld [vmem:[%s2186_s1 + $0x160] sm:$0xff]  }
  0x29   :  { %1613 = vmatprep.subr.bf16.mxu0 %v1717_v6 }
  0x2a   :  { %v202_v9 = vsel %vm1944_vm8, %v197_v4, %v201_v56 }
  0x2b   :  { %1554 = vmatpush3.bf16.msra.mxu1 %v1716_v5  ;;  %v207_v5 = vrot.slane %v206_v63, 4  ;;  %v907_v63 = vor.u32 %v906_v55, %v903_v47 }
  0x2c   :  { %1555 = vmatprep.subr.bf16.mxu1 %v1718_v7  ;;  %1614 = vmatpush3.bf16.msra.mxu0 %v1717_v6  ;;  %v735_v6 = vrot.slane %v733_v62, 4  ;;  %v899_v62 = vrot.slane %v897_v54, 4 }
  0x2d   :  { %1615 = vmatprep.subr.bf16.mxu0 %v1719_v13  ;;  %v212_v10 = vsel %vm1944_vm8, %v207_v5, %v211_v1  ;;  %v929_v1 = vshrl.u32 %v877_v52, 16 }
  0x2e   :  { %v1313_v15 = vcombine.low %v202_v9, %v212_v10  ;;  %v908_v5 = vsel %vm2061_vm14, %v899_v62, %v907_v63  ;;  %v932_v10 = vshll.u32 %v877_v52, 16 }
  0x2f   :  { %1556 = vmatpush3.bf16.msra.mxu1 %v1718_v7  ;;  %v736_v7 = vrot.slane %v714_v2, 6  ;;  %v1738_v2 = vld [vmem:[%s2186_s1 + $0xa8] sm:$0xff]   ;;  %v931_v19 = vrot.slane %v929_v1, 6 }
  0x30   :  { %1557 = vmatprep.subr.bf16.mxu1 %v1720_v20  ;;  %1616 = vmatpush3.bf16.msra.mxu0 %v1719_v13 }
  0x31   :  { %1617 = vmatprep.subr.bf16.mxu0 %v1721_v26  ;;  %v737_v13 = vsel %vm1932_vm7, %v735_v6, %v736_v7 }
  0x32   :  { %v1395_v16 = vcombine.low %v734_v12, %v737_v13  ;;  %v350_v12 = vld [vmem:[%s2185_s0 + $0xc] sm:$0xe]  ;;  %v371_v13 = vrot.slane %v351_v3, 5 }
  0x33   :  { %1558 = vmatpush3.bf16.msra.mxu1 %v1720_v20  ;;  %v349_v20 = vld [vmem:[%s2185_s0 + $0x8] sm:$0x1] }
  0x34   :  { %1559 = vmatprep.subr.bf16.mxu1 %v1722_v40  ;;  %1618 = vmatpush3.bf16.msra.mxu0 %v1721_v26  ;;  %v367_v25 = vrot.slane %v349_v20, 5  ;;  %v872_v26 = vld [vmem:[%s2185_s0] sm:$0xc]  ;;  %v934_v20 = vrot.slane %v932_v10, 7 }
  0x35   :  { %1619 = vmatprep.subr.bf16.mxu0 %v1723_v45  ;;  %v882_v34 = vshrl.u32 %v872_v26, 16  ;;  %v885_v35 = vshll.u32 %v872_v26, 16 }
  0x36   :  { %v368_v33 = vsel %vm2018_vm11, %v366_v29, %v367_v25 }
  0x37   :  { %1560 = vmatpush3.bf16.msra.mxu1 %v1722_v40  ;;  %v1340_v37 = vcombine.low %v365_v28, %v368_v33  ;;  %v875_v40 = vld [vmem:[%s2185_s0 + $0xc] sm:$0xc]  ;;  %v884_v42 = vrot.slane %v882_v34, 6  ;;  %v887_v43 = vrot.slane %v885_v35, 7 }
  0x38   :  { %1561 = vmatprep.subr.bf16.mxu1 %v1724_v59  ;;  %1620 = vmatpush3.bf16.msra.mxu0 %v1723_v45  ;;  %v876_v45 = vld [vmem:[%s2185_s0 + $0x10] sm:$0xf]  ;;  %v910_v49 = vshrl.u32 %v875_v40, 16  ;;  %v913_v56 = vshll.u32 %v875_v40, 16 }
  0x39   :  { %1621 = vmatprep.subr.bf16.mxu0 %v1725_v60  ;;  %v888_v51 = vor.u32 %v887_v43, %v884_v42  ;;  %v919_v57 = vshrl.u32 %v876_v45, 16 }
  0x3a   :  { %v915_v6 = vrot.slane %v913_v56, 7 }
  0x3b   :  { %1562 = vmatpush3.bf16.msra.mxu1 %v1724_v59  ;;  %v889_v59 = vrot.slane %v888_v51, 4  ;;  %v921_v7 = vrot.slane %v919_v57, 6 }
  0x3c   :  { %1563 = vmatprep.subr.bf16.mxu1 %v1726_v0  ;;  %1622 = vmatpush3.bf16.msra.mxu0 %v1725_v60  ;;  %v922_v60 = vshll.u32 %v876_v45, 16 }
  0x3d   :  { %1623 = vmatprep.subr.bf16.mxu0 %v1727_v8  ;;  %v898_v4 = vsel %vm2061_vm14, %v889_v59, %v897_v54 }
  0x3e   :  { %v924_v9 = vrot.slane %v922_v60, 7 }
  0x3f   :  { %1564 = vmatpush3.bf16.msra.mxu1 %v1726_v0  ;;  %v912_v0 = vrot.slane %v910_v49, 6 }
  0x40   :  { %1569 = vmatprep.subr.bf16.mxu1 %v1728_v11  ;;  %1624 = vmatpush3.bf16.msra.mxu0 %v1727_v8  ;;  %v1420_v8 = vcombine.low %v898_v4, %v908_v5  ;;  %v925_v18 = vor.u32 %v924_v9, %v921_v7 }
  0x41   :  { %1629 = vmatprep.subr.bf16.mxu0 %v1729_v14 }
  0x42   :  { %1566 = vmatmul.mubr.bf16.vlgmr.msra.gmra.mrb[0].mxu1 %v1313_v15  ;;  %v1740_v15 = vld [vmem:[%s2186_s1 + $0xb0] sm:$0xff]  }
  0x43   :  { %1570 = vmatpush3.bf16.msra.mxu1 %v1728_v11  ;;  %1626 = vmatmul.mubr.bf16.vlgmr.msra.gmra.mrb[0].mxu0 %v1395_v16  ;;  %v1739_v11 = vld [vmem:[%s2186_s1 + $0x168] sm:$0xff]   ;;  %v352_v16 = vld [vmem:[%s2185_s0 + $0x14] sm:$0x1] }
  0x44   :  { %1571 = vmatprep.subr.bf16.mxu1 %v1730_v17  ;;  %1630 = vmatpush3.bf16.msra.mxu0 %v1729_v14  ;;  %v1072_v14 = vld [vmem:[%s2185_s0 + $0x4] sm:$0xf] }
  0x45   :  { %1631 = vmatprep.subr.bf16.mxu0 %v1731_v23  ;;  %1585 = vmatprep.mubr.bf16.mxu1 %v1340_v37 }
  0x46   :  { %1645 = vmatprep.mubr.bf16.mxu0 %v1420_v8 }
  0x47   :  { %1572 = vmatpush3.bf16.msra.mxu1 %v1730_v17  ;;  %v916_v17 = vor.u32 %v915_v6, %v912_v0 }
  0x48   :  { %1573 = vmatprep.subr.bf16.mxu1 %v1732_v27  ;;  %1632 = vmatpush3.bf16.msra.mxu0 %v1731_v23 }
  0x49   :  { %1633 = vmatprep.subr.bf16.mxu0 %v1733_v32 }
  0x4b   :  { %1574 = vmatpush3.bf16.msra.mxu1 %v1732_v27 }
  0x4c   :  { %1575 = vmatprep.subr.bf16.mxu1 %v1734_v41  ;;  %1634 = vmatpush3.bf16.msra.mxu0 %v1733_v32 }
  0x4d   :  { %1635 = vmatprep.subr.bf16.mxu0 %v1735_v50 }
  0x4f   :  { %1576 = vmatpush3.bf16.msra.mxu1 %v1734_v41 }
  0x50   :  { %1577 = vmatprep.subr.bf16.mxu1 %v1736_v58  ;;  %1636 = vmatpush3.bf16.msra.mxu0 %v1735_v50 }
  0x51   :  { %1637 = vmatprep.subr.bf16.mxu0 %v1737_v61 }
  0x53   :  { %1578 = vmatpush3.bf16.msra.mxu1 %v1736_v58 }
  0x54   :  { %1579 = vmatprep.subr.bf16.mxu1 %v1738_v2  ;;  %1638 = vmatpush3.bf16.msra.mxu0 %v1737_v61 }
  0x55   :  { %9 = vsyncpa [#allocation4], 0  ;;  %1639 = vmatprep.subr.bf16.mxu0 %v1739_v11  ;;  %v1741_v22 = vld [vmem:[%s2186_s1 + $0x170] sm:$0xff]   ;;  %v1323_v23 = vrot.slane %v350_v12, 9  ;;  %v1088_v24 = vrot.slane %v1072_v14, 7  ;;  %v373_v25 = vrot.slane %v371_v13, 4  ;;  %v935_v32 = vor.u32 %v934_v20, %v931_v19 }
  0x56   :  { %v374_v26 = vrot.slane %v352_v16, 5  ;;  %v1071_v27 = vld [vmem:[%s2185_s0] sm:$0x8]  ;;  %v1073_v28 = vld [vmem:[%s2185_s0 + $0x8] sm:$0x7]  ;;  %v1742_v29 = vld [vmem:[%s2186_s1 + $0xb8] sm:$0xff]  }
  0x57   :  { %1580 = vmatpush3.bf16.msra.mxu1 %v1738_v2  ;;  %vm1083_vm15 = vcmask 1040384   ;;  %vm1084_vm0 = vcmask 1044484   ;;  %v917_v30 = vrot.slane %v916_v17, 4  ;;  %v927_v31 = vrot.slane %v925_v18, 4  ;;  %v1743_v33 = vld [vmem:[%s2186_s1 + $0x178] sm:$0xff]   ;;  %v1744_v43 = vld [vmem:[%s2186_s1 + $0x180] sm:$0xff]  }
  0x58   :  { %1581 = vmatprep.subr.bf16.mxu1 %v1740_v15  ;;  %1640 = vmatpush3.bf16.msra.mxu0 %v1739_v11  ;;  %v1430_v34 = vrot.slane %v1071_v27, 11  ;;  %v1090_v35 = vrot.slane %v1088_v24, 4  ;;  %v1091_v36 = vrot.slane %v1073_v28, 7  ;;  %v372_v37 = vsel %vm2018_vm11, %v1323_v23, %v371_v13  ;;  %vm2115_vm1 = vmor %vm1083_vm15, %vm1084_vm0  ;;  %v1745_v47 = vld [vmem:[%s2186_s1 + $0x188] sm:$0xff]   ;;  %v1746_v48 = vld [vmem:[%s2186_s1 + $0x190] sm:$0xff]   ;;  %s1776_s24 = smov [#allocation3]  }
  0x59   :  { %1641 = vmatprep.subr.bf16.mxu0 %v1741_v22  ;;  %v375_v38 = vsel %vm2018_vm11, %v373_v25, %v374_v26  ;;  %v926_v40 = vsel %vm2061_vm14, %v917_v30, %v925_v18  ;;  %v936_v41 = vsel %vm2061_vm14, %v927_v31, %v935_v32  ;;  %v1747_v49 = vld [vmem:[%s2186_s1 + $0x198] sm:$0xff]   ;;  %v1748_v50 = vld [vmem:[%s2186_s1 + $0x1a0] sm:$0xff]   ;;  %v1749_v51 = vld [vmem:[%s2186_s1 + $0x1a8] sm:$0xff]   ;;  %s1278_s25 = sshll.u32 %s1776_s24, 4  ;;  %vm1268_vm2 = vcmask 1041409   ;;  %s1279_s25 = int_to_ptr.vmem [resolvable:$true] %s1278_s25 }
  0x5a   :  { %v1341_v42 = vcombine.low %v372_v37, %v375_v38  ;;  %v1089_v21 = vsel %vm2115_vm1, %v1430_v34, %v1088_v24  ;;  %v1092_v44 = vsel %vm2115_vm1, %v1090_v35, %v1091_v36  ;;  %v1421_v45 = vcombine.low %v926_v40, %v936_v41  ;;  %v1075_v52 = vld [vmem:[%s2185_s0 + $0x10] sm:$0xf]  ;;  %v1074_v55 = vld [vmem:[%s2185_s0 + $0xc] sm:$0x8]  ;;  %v1076_v56 = vld [vmem:[%s2185_s0 + $0x14] sm:$0x7]  ;;  %p1757_p1 = scmp.lt.s32.totalorder %s1279_s25, %s1279_s25 }
  0x5b   :  { %1582 = vmatpush3.bf16.msra.mxu1 %v1740_v15  ;;  %v1448_v46 = vcombine.low %v1089_v21, %v1092_v44  ;;  %v1095_v53 = vrot.slane %v1075_v52, 7  ;;  %v1750_v54 = vld [vmem:[%s2186_s1 + $0x1b0] sm:$0xff]   ;;  %v1431_v57 = vrot.slane %v1074_v55, 11  ;;  %v1098_v59 = vrot.slane %v1076_v56, 7  ;;  %v1751_v60 = vld [vmem:[%s2186_s1 + $0x1b8] sm:$0xff]   ;;  %v1234_v7 = vld [vmem:[%s2188_s3] sm:$0xff] }
  0x5c   :  { %1583 = vmatprep.subr.bf16.mxu1 %v1742_v29  ;;  %1642 = vmatpush3.bf16.msra.mxu0 %v1741_v22  ;;  %v1235_v10 = vld [vmem:[%s2188_s3 + $0x8] sm:$0xff]  ;;  %v1458_v31 = vld [vmem:[%s2187_s2] ss:$0 sm:$0xff]  ;;  %s1752_s26 = scalar_lea.vmem %s1279_s25, 32 }
  0x5d   :  { %1643 = vmatprep.subr.bf16.mxu0 %v1743_v33  ;;  %v1097_v58 = vrot.slane %v1095_v53, 4  ;;  %v1096_v61 = vsel %vm2115_vm1, %v1431_v57, %v1095_v53  ;;  %p1753_p0 = scmp.ne.s32.totalorder %s1279_s25, %s1752_s26  ;;  %p1758_p2 = scmp.lt.s32.totalorder %s1752_s26, %s1752_s26 }
  0x5f   :  { %1584 = vmatpush3.bf16.msra.mxu1 %v1742_v29  ;;  %v1099_v62 = vsel %vm2115_vm1, %v1097_v58, %v1098_v59  ;;  %p1759_p3 = por %p1758_p2, %p1757_p1 }
  0x60   :  { %1644 = vmatpush3.bf16.msra.mxu0 %v1743_v33  ;;  %v1449_v63 = vcombine.low %v1096_v61, %v1099_v62 }
  0x61   :  { %1649 = vmatprep.subr.bf16.mxu0 %v1744_v43  ;;  %p1760_p4 = pnand %p1759_p3, %p1753_p0 }
  0x62   :  { %1586 = vmatmul.mubr.bf16.vlgmr.msra.gmra.mrb[0].mxu1 %v1341_v42 }
  0x63   :  { %1646 = vmatmul.mubr.bf16.vlgmr.msra.gmra.mrb[0].mxu0 %v1421_v45 }
  0x64   :  { %1650 = vmatpush3.bf16.msra.mxu0 %v1744_v43  ;;  %1665 = vmatprep.mubr.bf16.mxu0 %v1448_v46 }
  0x65   :  { %1651 = vmatprep.subr.bf16.mxu0 %v1745_v47 }
  0x68   :  { %1652 = vmatpush3.bf16.msra.mxu0 %v1745_v47 }
  0x69   :  { %1653 = vmatprep.subr.bf16.mxu0 %v1746_v48 }
  0x6c   :  { %1654 = vmatpush3.bf16.msra.mxu0 %v1746_v48 }
  0x6d   :  { %1655 = vmatprep.subr.bf16.mxu0 %v1747_v49 }
  0x70   :  { %1656 = vmatpush3.bf16.msra.mxu0 %v1747_v49 }
  0x71   :  { %1657 = vmatprep.subr.bf16.mxu0 %v1748_v50 }
  0x74   :  { %1658 = vmatpush3.bf16.msra.mxu0 %v1748_v50 }
  0x75   :  { %1659 = vmatprep.subr.bf16.mxu0 %v1749_v51 }
  0x78   :  { %1660 = vmatpush3.bf16.msra.mxu0 %v1749_v51 }
  0x79   :  { %1661 = vmatprep.subr.bf16.mxu0 %v1750_v54 }
  0x7c   :  { %1662 = vmatpush3.bf16.msra.mxu0 %v1750_v54 }
  0x7d   :  { %1663 = vmatprep.subr.bf16.mxu0 %v1751_v60 }
  0x80   :  { %1664 = vmatpush3.bf16.msra.mxu0 %v1751_v60 }
  0x83   :  { %1666 = vmatmul.mubr.bf16.vlgmr.msra.gmra.mrb[0].mxu0 %v1449_v63 }
 0x135   :  { %v1587_v0 = vpop.f32.mrb[0].mxu1 }
 0x136   :  { %v483_v1 = vpop.f32.mrb[1].mxu1 }
 0x137   :  { %v1588_v2 = vpop.f32.mrb[2].mxu1 }
 0x138   :  { %v486_v3 = vpop.f32.mrb[3].mxu1 }
 0x156   :  { %v1667_v4 = vpop.f32.mrb[0].mxu0 }
 0x157   :  { %v1669_v5 = vadd.f32 %v1667_v4, %v1587_v0  ;;  %v1207_v6 = vpop.f32.mrb[1].mxu0 }
 0x158   :  { %v1670_v8 = vadd.f32 %v1207_v6, %v483_v1  ;;  %v1668_v9 = vpop.f32.mrb[2].mxu0 }
 0x159   :  { %v1671_v11 = vadd.f32 %v1668_v9, %v1588_v2  ;;  %v1210_v12 = vpop.f32.mrb[3].mxu0  ;;  %v1238_v14 = vadd.f32 %v1669_v5, %v1234_v7 }
 0x15a   :  { %v1672_v13 = vadd.f32 %v1210_v12, %v486_v3  ;;  %v1236_v16 = vadd.f32 %v1670_v8, %v1234_v7 }
 0x15b   :  { %v1239_v15 = vadd.f32 %v1671_v11, %v1235_v10 }
 0x15c   :  { %v1237_v17 = vadd.f32 %v1672_v13, %v1235_v10 }
 0x15d   :  { %v1247_v18 = vmax.f32 %v1238_v14, %v1239_v15 }
 0x15e   :  { %v1240_v19 = vmax.f32 %v1236_v16, %v1237_v17 }
 0x15f   :  { %v1248_v20 = vrot.slane %v1247_v18, 4 }
 0x160   :  { %v1241_v22 = vrot.slane %v1240_v19, 4 }
 0x161   :  { %v1249_v23 = vmax.f32 %v1247_v18, %v1248_v20 }
 0x162   :  { %v1242_v24 = vmax.f32 %v1240_v19, %v1241_v22 }
 0x163   :  { %v1250_v25 = vrot.slane %v1249_v23, 2 }
 0x164   :  { %v1243_v26 = vrot.slane %v1242_v24, 2 }
 0x165   :  { %v1251_v27 = vmax.f32 %v1249_v23, %v1250_v25 }
 0x166   :  { %v1244_v28 = vmax.f32 %v1242_v24, %v1243_v26 }
 0x167   :  { %v1252_v29 = vrot.slane %v1251_v27, 1 }
 0x168   :  { %v1245_v30 = vrot.slane %v1244_v28, 1 }
 0x169   :  { %v1253_v32 = vmax.f32 %v1251_v27, %v1252_v29 }
 0x16a   :  { %v1246_v33 = vmax.f32 %v1244_v28, %v1245_v30 }
 0x16b   :  { %v1262_v34 = vadd.f32 %v1458_v31, %v1253_v32 }
 0x16c   :  { %v1261_v35 = vadd.f32 %v1458_v31, %v1246_v33 }
 0x16d   :  { %v1264_v36 = vmax.f32 %v1262_v34, 0.0 }
 0x16e   :  { %v1263_v37 = vmax.f32 %v1261_v35, 0.0 }
 0x16f   :  { %v1267_v38 = vrot.slane %v1264_v36, 7 }
 0x171   :  { %v1269_v39 = vsel %vm1268_vm2, %v1267_v38, %v1263_v37 }
 0x172   :  { %1271 = vst [vmem:[#allocation3] sm:$0x3] %v1269_v39 }
 0x173   :  { %1763 = shalt.err (!%p1760_p4)
}
 0x174   :  { %s1764_s28 = scalar_lea.hbm %s2189_s4, 32 }
 0x175   :  { %p1765_p5 = scmp.ne.s32.totalorder %s2189_s4, %s1764_s28  ;;  %p1768_p6 = scmp.lt.u32.totalorder %s1764_s28, %s2189_s4 }
 0x177   :  { %p1770_p7 = pnand %p1768_p6, %p1765_p5 }
 0x179   :  { %1773 = shalt.err (!%p1770_p7)
}
 0x17a   :  { %1281 = dma.vmem_to_hbm [thread:$0]  %s1279_s25, 32, %s2189_s4, [#allocation4]  }
 0x17b   :  { %1774 = dma.done.wait [#allocation4], 32  }
 0x17c   :  { %1775 = vsyncadd [#allocation4], 4294967264 }
 0x17d   :  { %1285 = vsyncpa [#allocation4], 1 }

</bundles_post_ra>
